<compile_context>
chip_gen: v7x
topology: tpu7x:2x2x1
jax: 0.10.0
libtpu: 0.0.40
codegen_flags: <defaults>
</compile_context>

<pallas_src>
import functools

import jax
import jax.numpy as jnp
from jax.experimental import pallas as pl
from jax.experimental.pallas import tpu as pltpu


def _align8(n: int) -> int:
    return ((n + 7) // 8) * 8


# ----------------------------------------------------------------------------
# Fused kernel: GCN (2 layers) -> one-hot gather -> batched BiLSTM -> Linear
# ----------------------------------------------------------------------------
def fused_gcn_bilstm_kernel(ids_ref, a_ref, x_ref, gcn_ref, li_ref, rh_ref,
                            o_ref, *, in_dim, hid_dim, out_dim, H, L, BP,
                            r_b1, r_w2, r_b2, r_bi):
    f32, bf16 = jnp.float32, jnp.bfloat16

    # ---- static views into the packed parameter slabs (f32 in VMEM) --------
    W1 = gcn_ref[0:in_dim, :].astype(bf16)                       # (in, hid)
    b1 = gcn_ref[r_b1:r_b1 + 1, :]                               # (1, hid)
    W2 = gcn_ref[r_w2:r_w2 + hid_dim, 0:out_dim].astype(bf16)    # (hid, out)
    b2 = gcn_ref[r_b2:r_b2 + 1, 0:out_dim]                       # (1, out)

    # ---- GCN: two stacked layers, bf16 MXU operands / f32 accumulation -----
    A = a_ref[...].astype(bf16)                                  # (N, N)
    xw = jnp.dot(x_ref[...].astype(bf16), W1, preferred_element_type=f32)
    h1 = jnp.dot(A, xw.astype(bf16), preferred_element_type=f32) + b1
    # TODO(synk): dropout(p=0.2, training=True) skipped (identity / eval mode).
    hw = jnp.dot(h1.astype(bf16), W2, preferred_element_type=f32)
    x_gcn = jnp.dot(A, hw.astype(bf16), preferred_element_type=f32) + b2

    # ---- gather node rows via one-hot matmul (0/1 values -> exact in bf16) --
    N = a_ref.shape[0]
    LB = ids_ref.shape[0]
    node_iota = jax.lax.broadcasted_iota(jnp.int32, (LB, N), 1)
    onehot = (node_iota == ids_ref[...]).astype(bf16)            # (L*BP, N)
    xseq = jnp.dot(onehot, x_gcn.astype(bf16), preferred_element_type=f32)

    # ---- merged fwd/bwd LSTM input projection: single (L*BP, 8H) matmul ----
    WI = li_ref[0:out_dim, :].astype(bf16)                       # (out, 8H) = [wif|wib]
    BI = li_ref[r_bi:r_bi + 1, :]                                # (1, 8H)   = [bf |bb ]
    proj = jnp.dot(xseq.astype(bf16), WI, preferred_element_type=f32) + BI
    xproj = proj[:, 0:4 * H]                                     # fwd inputs (L*BP, 4H)

    # ---- forward LSTM recurrence, batched over BP, statically unrolled -----
    Whf = rh_ref[0:H, :].astype(bf16)                            # (H, 4H)
    h = jnp.zeros((BP, H), f32)
    c = jnp.zeros((BP, H), f32)
    for t in range(L):              # per-timestep slices are whole (8,128) tiles
        z = xproj[t * BP:(t + 1) * BP, :] + jnp.dot(
            h.astype(bf16), Whf, preferred_element_type=f32)     # (BP, 4H)
        zs = jax.nn.sigmoid(z)            # full-lane sigmoid -> i, f, o gates
        g = jnp.tanh(z[:, 2 * H:3 * H])   # tanh only on the g-gate slice
        c = zs[:, H:2 * H] * c + zs[:, 0:H] * g
        h = zs[:, 3 * H:4 * H] * jnp.tanh(c)

    # ---- backward direction: single step on x_{L-1} from zero state --------
    # h0 == 0  =>  h0 @ W_hh_bwd == 0 exactly, so the recurrent matmul is omitted.
    zb = proj[(L - 1) * BP:L * BP, 4 * H:8 * H]                  # (BP, 4H)
    zbs = jax.nn.sigmoid(zb)
    gb = jnp.tanh(zb[:, 2 * H:3 * H])
    cb = zbs[:, 0:H] * gb                                        # f*c0 + i*g, c0 == 0
    hb = zbs[:, 3 * H:4 * H] * jnp.tanh(cb)

    # ---- Linear(2H -> C) on concat([h, hb]) as two half matmuls ------------
    # Head weights pre-padded to 4H(=128) lanes -> one lane-dense output store.
    Wlf = rh_ref[H:2 * H, :].astype(bf16)
    Wlb = rh_ref[2 * H:3 * H, :].astype(bf16)
    bl = rh_ref[3 * H:3 * H + 1, :]
    o_ref[...] = (jnp.dot(h.astype(bf16), Wlf, preferred_element_type=f32)
                  + jnp.dot(hb.astype(bf16), Wlb, preferred_element_type=f32)
                  + bl)


def gcn_bilstm_forward(A, X, token_global_ids, W1, b1, W2, b2,
                       wif, whf, bf, wib, whb, bb, wl, bl):
    del whb  # backward direction starts from zero state -> recurrent term is 0
    B, L = token_global_ids.shape
    N, in_dim = X.shape
    hid_dim = W1.shape[1]
    out_dim = W2.shape[1]
    H = whf.shape[0]
    C = wl.shape[1]
    BP = 8                         # pad batch to the full 8-sublane width
    assert C <= 4 * H and (4 * H) % 128 == 0

    # ---- ids, padded to BP instances, flattened time-major: row = t*BP + b --
    ids_p = jnp.zeros((BP, L), jnp.int32).at[:B, :].set(
        token_global_ids.astype(jnp.int32))
    ids_tmajor = ids_p.T.reshape(L * BP, 1)

    # ---- packed parameter slabs (f32; weights cast to bf16 at the MXU) -----
    # GCN slab (lane width = hid): [W1 ; b1 ; pad ; W2 ; b2]
    r_b1 = in_dim
    r_w2 = _align8(in_dim + 1)
    r_b2 = r_w2 + hid_dim
    gcn = jnp.zeros((r_b2 + 1, hid_dim), jnp.float32)
    gcn = gcn.at[0:in_dim, :].set(W1)
    gcn = gcn.at[r_b1, :].set(b1)
    gcn = gcn.at[r_w2:r_w2 + hid_dim, 0:out_dim].set(W2)
    gcn = gcn.at[r_b2, 0:out_dim].set(b2)

    # LSTM input slab (lane width = 8H): [wif | wib ; bf | bb]
    r_bi = _align8(out_dim)
    li = jnp.zeros((r_bi + 1, 8 * H), jnp.float32)
    li = li.at[0:out_dim, 0:4 * H].set(wif)
    li = li.at[0:out_dim, 4 * H:].set(wib)
    li = li.at[r_bi, 0:4 * H].set(bf)
    li = li.at[r_bi, 4 * H:].set(bb)

    # Recurrent + head slab (lane width = 4H): [whf ; wl_fwd ; wl_bwd ; bl]
    rh = jnp.zeros((3 * H + 1, 4 * H), jnp.float32)
    rh = rh.at[0:H, :].set(whf)
    rh = rh.at[H:2 * H, 0:C].set(wl[0:H, :])
    rh = rh.at[2 * H:3 * H, 0:C].set(wl[H:2 * H, :])
    rh = rh.at[3 * H, 0:C].set(bl)

    kernel = functools.partial(
        fused_gcn_bilstm_kernel, in_dim=in_dim, hid_dim=hid_dim,
        out_dim=out_dim, H=H, L=L, BP=BP,
        r_b1=r_b1, r_w2=r_w2, r_b2=r_b2, r_bi=r_bi)

    vmem = pl.BlockSpec(memory_space=pltpu.MemorySpace.VMEM)
    out = pl.pallas_call(
        kernel,
        out_shape=jax.ShapeDtypeStruct((BP, 4 * H), jnp.float32),
        in_specs=[vmem] * 6,
        out_specs=vmem,
    )(ids_tmajor, A, X, gcn, li, rh)
    return out[:B, :C]


# ----------------------------------------------------------------------------
# Pure-JAX f32 reference (same math) for a correctness check
# ----------------------------------------------------------------------------
def ref_forward(A, X, ids, W1, b1, W2, b2, wif, whf, bf, wib, whb, bb, wl, bl):
    h = A @ (X @ W1) + b1
    h = A @ (h @ W2) + b2
    Xseq = h[ids]                                   # (B, L, D)
    B, L, _ = Xseq.shape
    H = whf.shape[0]

    def cell(hh, cc, x_t, wi, wh, b):
        z = x_t @ wi + hh @ wh + b
        i = jax.nn.sigmoid(z[:, 0:H])
        f = jax.nn.sigmoid(z[:, H:2 * H])
        g = jnp.tanh(z[:, 2 * H:3 * H])
        o = jax.nn.sigmoid(z[:, 3 * H:4 * H])
        cc = f * cc + i * g
        return o * jnp.tanh(cc), cc

    preds = []
    for b_idx in range(B):
        hh = jnp.zeros((1, H)); cc = jnp.zeros((1, H))
        for t in range(L):
            hh, cc = cell(hh, cc, Xseq[b_idx, t:t + 1, :], wif, whf, bf)
        hb, _ = cell(jnp.zeros((1, H)), jnp.zeros((1, H)),
                     Xseq[b_idx, L - 1:L, :], wib, whb, bb)
        feat = jnp.concatenate([hh, hb], axis=1)
        preds.append(feat @ wl + bl)
    return jnp.squeeze(jnp.stack(preds))


# ----------------------------------------------------------------------------
if __name__ == "__main__":
    key = jax.random.PRNGKey(0)
    N, in_dim, hid_dim, out_dim, num_classes = 32, 16, 32, 16, 4
    H, B, L = 32, 2, 8                    # LSTM hidden, instances, seq len
    keys = jax.random.split(key, 16)

    def unif(k, shape, s):
        return jax.random.uniform(k, shape, jnp.float32, -s, s)

    # inputs: dense row-normalized adjacency, node features, per-instance ids
    A_raw = jax.random.uniform(keys[0], (N, N), jnp.float32)
    A = A_raw / jnp.sum(A_raw, axis=1, keepdims=True)
    X = jax.random.normal(keys[1], (N, in_dim), jnp.float32)
    token_global_ids = jax.random.randint(keys[2], (B, L), 0, N)

    # GCN params (torch init: uniform(+-1/sqrt(out_dim)))
    s1 = 1.0 / (hid_dim ** 0.5)
    W1 = unif(keys[3], (in_dim, hid_dim), s1); b1 = unif(keys[4], (hid_dim,), s1)
    s2 = 1.0 / (out_dim ** 0.5)
    W2 = unif(keys[5], (hid_dim, out_dim), s2); b2 = unif(keys[6], (out_dim,), s2)

    # BiLSTM params (stored pre-transposed: (D,4H)/(H,4H)); ih/hh biases summed.
    sl = 1.0 / (H ** 0.5)
    wif = unif(keys[7], (out_dim, 4 * H), sl)
    whf = unif(keys[8], (H, 4 * H), sl)
    bf = unif(keys[9], (4 * H,), sl) + unif(keys[10], (4 * H,), sl)
    wib = unif(keys[11], (out_dim, 4 * H), sl)
    whb = unif(keys[12], (H, 4 * H), sl)
    bb = unif(keys[13], (4 * H,), sl) + unif(keys[14], (4 * H,), sl)

    # Linear head (2H -> num_classes), pre-transposed
    sf = 1.0 / ((2 * H) ** 0.5)
    kl1, kl2 = jax.random.split(keys[15])
    wl = unif(kl1, (2 * H, num_classes), sf)
    bl = unif(kl2, (num_classes,), sf)

    # ---- forward: one fused Pallas kernel ----
    preds = gcn_bilstm_forward(A, X, token_global_ids, W1, b1, W2, b2,
                               wif, whf, bf, wib, whb, bb, wl, bl)
    preds = jax.block_until_ready(preds)             # (B, num_classes)

    ref = ref_forward(A, X, token_global_ids, W1, b1, W2, b2,
                      wif, whf, bf, wib, whb, bb, wl, bl)
    assert preds.shape == (B, num_classes)
    # bf16 MXU operands vs. f32 reference -> loosened (but still tight) tol.
    assert jnp.max(jnp.abs(preds - ref)) < 3e-2, "kernel/reference mismatch"

    print("KERNEL_OK")
</pallas_src>

<mosaic_0001>
module attributes {stable_mosaic.version = 11 : i64} {
  func.func @fused_gcn_bilstm_kernel(%arg0: memref<64x1xi32, #tpu.memory_space<vmem>>, %arg1: memref<32x32xf32, #tpu.memory_space<vmem>>, %arg2: memref<32x16xf32, #tpu.memory_space<vmem>>, %arg3: memref<57x32xf32, #tpu.memory_space<vmem>>, %arg4: memref<17x256xf32, #tpu.memory_space<vmem>>, %arg5: memref<97x128xf32, #tpu.memory_space<vmem>>, %arg6: memref<8x128xf32, #tpu.memory_space<vmem>>) attributes {dimension_semantics = [], scalar_prefetch = 0 : i64, scratch_operands = 0 : i64, tpu.core_type = #tpu.core_type<tc>} {
    %c0 = arith.constant 0 : index
    %c0_0 = arith.constant 0 : index
    %0 = vector.load %arg3[%c0, %c0_0] : memref<57x32xf32, #tpu.memory_space<vmem>>, vector<16x32xf32>
    %1 = arith.truncf %0 : vector<16x32xf32> to vector<16x32xbf16>
    %c16 = arith.constant 16 : index
    %c0_1 = arith.constant 0 : index
    %2 = vector.load %arg3[%c16, %c0_1] : memref<57x32xf32, #tpu.memory_space<vmem>>, vector<1x32xf32>
    %c24 = arith.constant 24 : index
    %c0_2 = arith.constant 0 : index
    %3 = vector.load %arg3[%c24, %c0_2] : memref<57x32xf32, #tpu.memory_space<vmem>>, vector<32x16xf32>
    %4 = arith.truncf %3 : vector<32x16xf32> to vector<32x16xbf16>
    %c56 = arith.constant 56 : index
    %c0_3 = arith.constant 0 : index
    %5 = vector.load %arg3[%c56, %c0_3] : memref<57x32xf32, #tpu.memory_space<vmem>>, vector<1x16xf32>
    %c0_4 = arith.constant 0 : index
    %c0_5 = arith.constant 0 : index
    %6 = vector.load %arg1[%c0_4, %c0_5] : memref<32x32xf32, #tpu.memory_space<vmem>>, vector<32x32xf32>
    %7 = arith.truncf %6 : vector<32x32xf32> to vector<32x32xbf16>
    %c0_6 = arith.constant 0 : index
    %c0_7 = arith.constant 0 : index
    %8 = vector.load %arg2[%c0_6, %c0_7] : memref<32x16xf32, #tpu.memory_space<vmem>>, vector<32x16xf32>
    %9 = arith.truncf %8 : vector<32x16xf32> to vector<32x16xbf16>
    %cst = arith.constant dense<0.000000e+00> : vector<32x32xf32>
    %10 = tpu.matmul %9, %1, %cst {dimension_numbers = #tpu.dot_dimension_numbers<[1], [0], [0], [1], [0, 0, 1, 1], [], []>} : vector<32x16xbf16>, vector<16x32xbf16>, vector<32x32xf32> -> vector<32x32xf32>
    %11 = arith.truncf %10 : vector<32x32xf32> to vector<32x32xbf16>
    %cst_8 = arith.constant dense<0.000000e+00> : vector<32x32xf32>
    %12 = tpu.matmul %7, %11, %cst_8 {dimension_numbers = #tpu.dot_dimension_numbers<[1], [0], [0], [1], [0, 0, 1, 1], [], []>} : vector<32x32xbf16>, vector<32x32xbf16>, vector<32x32xf32> -> vector<32x32xf32>
    %13 = vector.broadcast %2 : vector<1x32xf32> to vector<32x32xf32>
    %14 = arith.addf %12, %13 : vector<32x32xf32>
    %15 = arith.truncf %14 : vector<32x32xf32> to vector<32x32xbf16>
    %cst_9 = arith.constant dense<0.000000e+00> : vector<32x16xf32>
    %16 = tpu.matmul %15, %4, %cst_9 {dimension_numbers = #tpu.dot_dimension_numbers<[1], [0], [0], [1], [0, 0, 1, 1], [], []>} : vector<32x32xbf16>, vector<32x16xbf16>, vector<32x16xf32> -> vector<32x16xf32>
    %17 = arith.truncf %16 : vector<32x16xf32> to vector<32x16xbf16>
    %cst_10 = arith.constant dense<0.000000e+00> : vector<32x16xf32>
    %18 = tpu.matmul %7, %17, %cst_10 {dimension_numbers = #tpu.dot_dimension_numbers<[1], [0], [0], [1], [0, 0, 1, 1], [], []>} : vector<32x32xbf16>, vector<32x16xbf16>, vector<32x16xf32> -> vector<32x16xf32>
    %19 = vector.broadcast %5 : vector<1x16xf32> to vector<32x16xf32>
    %20 = arith.addf %18, %19 : vector<32x16xf32>
    %21 = tpu.iota {dimensions = array<i32: 1>} : vector<64x32xi32>
    %c0_11 = arith.constant 0 : index
    %c0_12 = arith.constant 0 : index
    %22 = vector.load %arg0[%c0_11, %c0_12] : memref<64x1xi32, #tpu.memory_space<vmem>>, vector<64x1xi32>
    %23 = vector.broadcast %22 : vector<64x1xi32> to vector<64x32xi32>
    %24 = arith.cmpi eq, %21, %23 : vector<64x32xi32>
    %25 = arith.extui %24 : vector<64x32xi1> to vector<64x32xi32>
    %26 = arith.sitofp %25 : vector<64x32xi32> to vector<64x32xf32>
    %27 = arith.truncf %26 : vector<64x32xf32> to vector<64x32xbf16>
    %28 = arith.truncf %20 : vector<32x16xf32> to vector<32x16xbf16>
    %cst_13 = arith.constant dense<0.000000e+00> : vector<64x16xf32>
    %29 = tpu.matmul %27, %28, %cst_13 {dimension_numbers = #tpu.dot_dimension_numbers<[1], [0], [0], [1], [0, 0, 1, 1], [], []>} : vector<64x32xbf16>, vector<32x16xbf16>, vector<64x16xf32> -> vector<64x16xf32>
    %c0_14 = arith.constant 0 : index
    %c0_15 = arith.constant 0 : index
    %30 = vector.load %arg4[%c0_14, %c0_15] : memref<17x256xf32, #tpu.memory_space<vmem>>, vector<16x256xf32>
    %31 = arith.truncf %30 : vector<16x256xf32> to vector<16x256xbf16>
    %c16_16 = arith.constant 16 : index
    %c0_17 = arith.constant 0 : index
    %32 = vector.load %arg4[%c16_16, %c0_17] : memref<17x256xf32, #tpu.memory_space<vmem>>, vector<1x256xf32>
    %33 = arith.truncf %29 : vector<64x16xf32> to vector<64x16xbf16>
    %cst_18 = arith.constant dense<0.000000e+00> : vector<64x256xf32>
    %34 = tpu.matmul %33, %31, %cst_18 {dimension_numbers = #tpu.dot_dimension_numbers<[1], [0], [0], [1], [0, 0, 1, 1], [], []>} : vector<64x16xbf16>, vector<16x256xbf16>, vector<64x256xf32> -> vector<64x256xf32>
    %35 = vector.broadcast %32 : vector<1x256xf32> to vector<64x256xf32>
    %36 = arith.addf %34, %35 : vector<64x256xf32>
    %37 = vector.extract_strided_slice %36 {offsets = [0, 0], sizes = [64, 128], strides = [1, 1]} : vector<64x256xf32> to vector<64x128xf32>
    %c0_19 = arith.constant 0 : index
    %c0_20 = arith.constant 0 : index
    %38 = vector.load %arg5[%c0_19, %c0_20] : memref<97x128xf32, #tpu.memory_space<vmem>>, vector<32x128xf32>
    %39 = arith.truncf %38 : vector<32x128xf32> to vector<32x128xbf16>
    %cst_21 = arith.constant 0.000000e+00 : f32
    %40 = vector.broadcast %cst_21 : f32 to vector<8x32xf32>
    %cst_22 = arith.constant 0.000000e+00 : f32
    %41 = vector.broadcast %cst_22 : f32 to vector<8x32xf32>
    %42 = vector.extract_strided_slice %37 {offsets = [0, 0], sizes = [8, 128], strides = [1, 1]} : vector<64x128xf32> to vector<8x128xf32>
    %43 = arith.truncf %40 : vector<8x32xf32> to vector<8x32xbf16>
    %cst_23 = arith.constant dense<0.000000e+00> : vector<8x128xf32>
    %44 = tpu.matmul %43, %39, %cst_23 {dimension_numbers = #tpu.dot_dimension_numbers<[1], [0], [0], [1], [0, 0, 1, 1], [], []>} : vector<8x32xbf16>, vector<32x128xbf16>, vector<8x128xf32> -> vector<8x128xf32>
    %45 = arith.addf %42, %44 : vector<8x128xf32>
    %46 = arith.negf %45 : vector<8x128xf32>
    %47 = math.exp %46 : vector<8x128xf32>
    %cst_24 = arith.constant 1.000000e+00 : f32
    %48 = vector.broadcast %cst_24 : f32 to vector<8x128xf32>
    %49 = arith.addf %48, %47 : vector<8x128xf32>
    %50 = arith.divf %48, %49 : vector<8x128xf32>
    %51 = vector.extract_strided_slice %45 {offsets = [0, 64], sizes = [8, 32], strides = [1, 1]} : vector<8x128xf32> to vector<8x32xf32>
    %52 = math.tanh %51 : vector<8x32xf32>
    %53 = vector.extract_strided_slice %50 {offsets = [0, 32], sizes = [8, 32], strides = [1, 1]} : vector<8x128xf32> to vector<8x32xf32>
    %54 = arith.mulf %53, %41 : vector<8x32xf32>
    %55 = vector.extract_strided_slice %50 {offsets = [0, 0], sizes = [8, 32], strides = [1, 1]} : vector<8x128xf32> to vector<8x32xf32>
    %56 = arith.mulf %55, %52 : vector<8x32xf32>
    %57 = arith.addf %54, %56 : vector<8x32xf32>
    %58 = vector.extract_strided_slice %50 {offsets = [0, 96], sizes = [8, 32], strides = [1, 1]} : vector<8x128xf32> to vector<8x32xf32>
    %59 = math.tanh %57 : vector<8x32xf32>
    %60 = arith.mulf %58, %59 : vector<8x32xf32>
    %61 = vector.extract_strided_slice %37 {offsets = [8, 0], sizes = [8, 128], strides = [1, 1]} : vector<64x128xf32> to vector<8x128xf32>
    %62 = arith.truncf %60 : vector<8x32xf32> to vector<8x32xbf16>
    %cst_25 = arith.constant dense<0.000000e+00> : vector<8x128xf32>
    %63 = tpu.matmul %62, %39, %cst_25 {dimension_numbers = #tpu.dot_dimension_numbers<[1], [0], [0], [1], [0, 0, 1, 1], [], []>} : vector<8x32xbf16>, vector<32x128xbf16>, vector<8x128xf32> -> vector<8x128xf32>
    %64 = arith.addf %61, %63 : vector<8x128xf32>
    %65 = arith.negf %64 : vector<8x128xf32>
    %66 = math.exp %65 : vector<8x128xf32>
    %cst_26 = arith.constant 1.000000e+00 : f32
    %67 = vector.broadcast %cst_26 : f32 to vector<8x128xf32>
    %68 = arith.addf %67, %66 : vector<8x128xf32>
    %69 = arith.divf %67, %68 : vector<8x128xf32>
    %70 = vector.extract_strided_slice %64 {offsets = [0, 64], sizes = [8, 32], strides = [1, 1]} : vector<8x128xf32> to vector<8x32xf32>
    %71 = math.tanh %70 : vector<8x32xf32>
    %72 = vector.extract_strided_slice %69 {offsets = [0, 32], sizes = [8, 32], strides = [1, 1]} : vector<8x128xf32> to vector<8x32xf32>
    %73 = arith.mulf %72, %57 : vector<8x32xf32>
    %74 = vector.extract_strided_slice %69 {offsets = [0, 0], sizes = [8, 32], strides = [1, 1]} : vector<8x128xf32> to vector<8x32xf32>
    %75 = arith.mulf %74, %71 : vector<8x32xf32>
    %76 = arith.addf %73, %75 : vector<8x32xf32>
    %77 = vector.extract_strided_slice %69 {offsets = [0, 96], sizes = [8, 32], strides = [1, 1]} : vector<8x128xf32> to vector<8x32xf32>
    %78 = math.tanh %76 : vector<8x32xf32>
    %79 = arith.mulf %77, %78 : vector<8x32xf32>
    %80 = vector.extract_strided_slice %37 {offsets = [16, 0], sizes = [8, 128], strides = [1, 1]} : vector<64x128xf32> to vector<8x128xf32>
    %81 = arith.truncf %79 : vector<8x32xf32> to vector<8x32xbf16>
    %cst_27 = arith.constant dense<0.000000e+00> : vector<8x128xf32>
    %82 = tpu.matmul %81, %39, %cst_27 {dimension_numbers = #tpu.dot_dimension_numbers<[1], [0], [0], [1], [0, 0, 1, 1], [], []>} : vector<8x32xbf16>, vector<32x128xbf16>, vector<8x128xf32> -> vector<8x128xf32>
    %83 = arith.addf %80, %82 : vector<8x128xf32>
    %84 = arith.negf %83 : vector<8x128xf32>
    %85 = math.exp %84 : vector<8x128xf32>
    %cst_28 = arith.constant 1.000000e+00 : f32
    %86 = vector.broadcast %cst_28 : f32 to vector<8x128xf32>
    %87 = arith.addf %86, %85 : vector<8x128xf32>
    %88 = arith.divf %86, %87 : vector<8x128xf32>
    %89 = vector.extract_strided_slice %83 {offsets = [0, 64], sizes = [8, 32], strides = [1, 1]} : vector<8x128xf32> to vector<8x32xf32>
    %90 = math.tanh %89 : vector<8x32xf32>
    %91 = vector.extract_strided_slice %88 {offsets = [0, 32], sizes = [8, 32], strides = [1, 1]} : vector<8x128xf32> to vector<8x32xf32>
    %92 = arith.mulf %91, %76 : vector<8x32xf32>
    %93 = vector.extract_strided_slice %88 {offsets = [0, 0], sizes = [8, 32], strides = [1, 1]} : vector<8x128xf32> to vector<8x32xf32>
    %94 = arith.mulf %93, %90 : vector<8x32xf32>
    %95 = arith.addf %92, %94 : vector<8x32xf32>
    %96 = vector.extract_strided_slice %88 {offsets = [0, 96], sizes = [8, 32], strides = [1, 1]} : vector<8x128xf32> to vector<8x32xf32>
    %97 = math.tanh %95 : vector<8x32xf32>
    %98 = arith.mulf %96, %97 : vector<8x32xf32>
    %99 = vector.extract_strided_slice %37 {offsets = [24, 0], sizes = [8, 128], strides = [1, 1]} : vector<64x128xf32> to vector<8x128xf32>
    %100 = arith.truncf %98 : vector<8x32xf32> to vector<8x32xbf16>
    %cst_29 = arith.constant dense<0.000000e+00> : vector<8x128xf32>
    %101 = tpu.matmul %100, %39, %cst_29 {dimension_numbers = #tpu.dot_dimension_numbers<[1], [0], [0], [1], [0, 0, 1, 1], [], []>} : vector<8x32xbf16>, vector<32x128xbf16>, vector<8x128xf32> -> vector<8x128xf32>
    %102 = arith.addf %99, %101 : vector<8x128xf32>
    %103 = arith.negf %102 : vector<8x128xf32>
    %104 = math.exp %103 : vector<8x128xf32>
    %cst_30 = arith.constant 1.000000e+00 : f32
    %105 = vector.broadcast %cst_30 : f32 to vector<8x128xf32>
    %106 = arith.addf %105, %104 : vector<8x128xf32>
    %107 = arith.divf %105, %106 : vector<8x128xf32>
    %108 = vector.extract_strided_slice %102 {offsets = [0, 64], sizes = [8, 32], strides = [1, 1]} : vector<8x128xf32> to vector<8x32xf32>
    %109 = math.tanh %108 : vector<8x32xf32>
    %110 = vector.extract_strided_slice %107 {offsets = [0, 32], sizes = [8, 32], strides = [1, 1]} : vector<8x128xf32> to vector<8x32xf32>
    %111 = arith.mulf %110, %95 : vector<8x32xf32>
    %112 = vector.extract_strided_slice %107 {offsets = [0, 0], sizes = [8, 32], strides = [1, 1]} : vector<8x128xf32> to vector<8x32xf32>
    %113 = arith.mulf %112, %109 : vector<8x32xf32>
    %114 = arith.addf %111, %113 : vector<8x32xf32>
    %115 = vector.extract_strided_slice %107 {offsets = [0, 96], sizes = [8, 32], strides = [1, 1]} : vector<8x128xf32> to vector<8x32xf32>
    %116 = math.tanh %114 : vector<8x32xf32>
    %117 = arith.mulf %115, %116 : vector<8x32xf32>
    %118 = vector.extract_strided_slice %37 {offsets = [32, 0], sizes = [8, 128], strides = [1, 1]} : vector<64x128xf32> to vector<8x128xf32>
    %119 = arith.truncf %117 : vector<8x32xf32> to vector<8x32xbf16>
    %cst_31 = arith.constant dense<0.000000e+00> : vector<8x128xf32>
    %120 = tpu.matmul %119, %39, %cst_31 {dimension_numbers = #tpu.dot_dimension_numbers<[1], [0], [0], [1], [0, 0, 1, 1], [], []>} : vector<8x32xbf16>, vector<32x128xbf16>, vector<8x128xf32> -> vector<8x128xf32>
    %121 = arith.addf %118, %120 : vector<8x128xf32>
    %122 = arith.negf %121 : vector<8x128xf32>
    %123 = math.exp %122 : vector<8x128xf32>
    %cst_32 = arith.constant 1.000000e+00 : f32
    %124 = vector.broadcast %cst_32 : f32 to vector<8x128xf32>
    %125 = arith.addf %124, %123 : vector<8x128xf32>
    %126 = arith.divf %124, %125 : vector<8x128xf32>
    %127 = vector.extract_strided_slice %121 {offsets = [0, 64], sizes = [8, 32], strides = [1, 1]} : vector<8x128xf32> to vector<8x32xf32>
    %128 = math.tanh %127 : vector<8x32xf32>
    %129 = vector.extract_strided_slice %126 {offsets = [0, 32], sizes = [8, 32], strides = [1, 1]} : vector<8x128xf32> to vector<8x32xf32>
    %130 = arith.mulf %129, %114 : vector<8x32xf32>
    %131 = vector.extract_strided_slice %126 {offsets = [0, 0], sizes = [8, 32], strides = [1, 1]} : vector<8x128xf32> to vector<8x32xf32>
    %132 = arith.mulf %131, %128 : vector<8x32xf32>
    %133 = arith.addf %130, %132 : vector<8x32xf32>
    %134 = vector.extract_strided_slice %126 {offsets = [0, 96], sizes = [8, 32], strides = [1, 1]} : vector<8x128xf32> to vector<8x32xf32>
    %135 = math.tanh %133 : vector<8x32xf32>
    %136 = arith.mulf %134, %135 : vector<8x32xf32>
    %137 = vector.extract_strided_slice %37 {offsets = [40, 0], sizes = [8, 128], strides = [1, 1]} : vector<64x128xf32> to vector<8x128xf32>
    %138 = arith.truncf %136 : vector<8x32xf32> to vector<8x32xbf16>
    %cst_33 = arith.constant dense<0.000000e+00> : vector<8x128xf32>
    %139 = tpu.matmul %138, %39, %cst_33 {dimension_numbers = #tpu.dot_dimension_numbers<[1], [0], [0], [1], [0, 0, 1, 1], [], []>} : vector<8x32xbf16>, vector<32x128xbf16>, vector<8x128xf32> -> vector<8x128xf32>
    %140 = arith.addf %137, %139 : vector<8x128xf32>
    %141 = arith.negf %140 : vector<8x128xf32>
    %142 = math.exp %141 : vector<8x128xf32>
    %cst_34 = arith.constant 1.000000e+00 : f32
    %143 = vector.broadcast %cst_34 : f32 to vector<8x128xf32>
    %144 = arith.addf %143, %142 : vector<8x128xf32>
    %145 = arith.divf %143, %144 : vector<8x128xf32>
    %146 = vector.extract_strided_slice %140 {offsets = [0, 64], sizes = [8, 32], strides = [1, 1]} : vector<8x128xf32> to vector<8x32xf32>
    %147 = math.tanh %146 : vector<8x32xf32>
    %148 = vector.extract_strided_slice %145 {offsets = [0, 32], sizes = [8, 32], strides = [1, 1]} : vector<8x128xf32> to vector<8x32xf32>
    %149 = arith.mulf %148, %133 : vector<8x32xf32>
    %150 = vector.extract_strided_slice %145 {offsets = [0, 0], sizes = [8, 32], strides = [1, 1]} : vector<8x128xf32> to vector<8x32xf32>
    %151 = arith.mulf %150, %147 : vector<8x32xf32>
    %152 = arith.addf %149, %151 : vector<8x32xf32>
    %153 = vector.extract_strided_slice %145 {offsets = [0, 96], sizes = [8, 32], strides = [1, 1]} : vector<8x128xf32> to vector<8x32xf32>
    %154 = math.tanh %152 : vector<8x32xf32>
    %155 = arith.mulf %153, %154 : vector<8x32xf32>
    %156 = vector.extract_strided_slice %37 {offsets = [48, 0], sizes = [8, 128], strides = [1, 1]} : vector<64x128xf32> to vector<8x128xf32>
    %157 = arith.truncf %155 : vector<8x32xf32> to vector<8x32xbf16>
    %cst_35 = arith.constant dense<0.000000e+00> : vector<8x128xf32>
    %158 = tpu.matmul %157, %39, %cst_35 {dimension_numbers = #tpu.dot_dimension_numbers<[1], [0], [0], [1], [0, 0, 1, 1], [], []>} : vector<8x32xbf16>, vector<32x128xbf16>, vector<8x128xf32> -> vector<8x128xf32>
    %159 = arith.addf %156, %158 : vector<8x128xf32>
    %160 = arith.negf %159 : vector<8x128xf32>
    %161 = math.exp %160 : vector<8x128xf32>
    %cst_36 = arith.constant 1.000000e+00 : f32
    %162 = vector.broadcast %cst_36 : f32 to vector<8x128xf32>
    %163 = arith.addf %162, %161 : vector<8x128xf32>
    %164 = arith.divf %162, %163 : vector<8x128xf32>
    %165 = vector.extract_strided_slice %159 {offsets = [0, 64], sizes = [8, 32], strides = [1, 1]} : vector<8x128xf32> to vector<8x32xf32>
    %166 = math.tanh %165 : vector<8x32xf32>
    %167 = vector.extract_strided_slice %164 {offsets = [0, 32], sizes = [8, 32], strides = [1, 1]} : vector<8x128xf32> to vector<8x32xf32>
    %168 = arith.mulf %167, %152 : vector<8x32xf32>
    %169 = vector.extract_strided_slice %164 {offsets = [0, 0], sizes = [8, 32], strides = [1, 1]} : vector<8x128xf32> to vector<8x32xf32>
    %170 = arith.mulf %169, %166 : vector<8x32xf32>
    %171 = arith.addf %168, %170 : vector<8x32xf32>
    %172 = vector.extract_strided_slice %164 {offsets = [0, 96], sizes = [8, 32], strides = [1, 1]} : vector<8x128xf32> to vector<8x32xf32>
    %173 = math.tanh %171 : vector<8x32xf32>
    %174 = arith.mulf %172, %173 : vector<8x32xf32>
    %175 = vector.extract_strided_slice %37 {offsets = [56, 0], sizes = [8, 128], strides = [1, 1]} : vector<64x128xf32> to vector<8x128xf32>
    %176 = arith.truncf %174 : vector<8x32xf32> to vector<8x32xbf16>
    %cst_37 = arith.constant dense<0.000000e+00> : vector<8x128xf32>
    %177 = tpu.matmul %176, %39, %cst_37 {dimension_numbers = #tpu.dot_dimension_numbers<[1], [0], [0], [1], [0, 0, 1, 1], [], []>} : vector<8x32xbf16>, vector<32x128xbf16>, vector<8x128xf32> -> vector<8x128xf32>
    %178 = arith.addf %175, %177 : vector<8x128xf32>
    %179 = arith.negf %178 : vector<8x128xf32>
    %180 = math.exp %179 : vector<8x128xf32>
    %cst_38 = arith.constant 1.000000e+00 : f32
    %181 = vector.broadcast %cst_38 : f32 to vector<8x128xf32>
    %182 = arith.addf %181, %180 : vector<8x128xf32>
    %183 = arith.divf %181, %182 : vector<8x128xf32>
    %184 = vector.extract_strided_slice %178 {offsets = [0, 64], sizes = [8, 32], strides = [1, 1]} : vector<8x128xf32> to vector<8x32xf32>
    %185 = math.tanh %184 : vector<8x32xf32>
    %186 = vector.extract_strided_slice %183 {offsets = [0, 32], sizes = [8, 32], strides = [1, 1]} : vector<8x128xf32> to vector<8x32xf32>
    %187 = arith.mulf %186, %171 : vector<8x32xf32>
    %188 = vector.extract_strided_slice %183 {offsets = [0, 0], sizes = [8, 32], strides = [1, 1]} : vector<8x128xf32> to vector<8x32xf32>
    %189 = arith.mulf %188, %185 : vector<8x32xf32>
    %190 = arith.addf %187, %189 : vector<8x32xf32>
    %191 = vector.extract_strided_slice %183 {offsets = [0, 96], sizes = [8, 32], strides = [1, 1]} : vector<8x128xf32> to vector<8x32xf32>
    %192 = math.tanh %190 : vector<8x32xf32>
    %193 = arith.mulf %191, %192 : vector<8x32xf32>
    %194 = vector.extract_strided_slice %36 {offsets = [56, 128], sizes = [8, 128], strides = [1, 1]} : vector<64x256xf32> to vector<8x128xf32>
    %195 = arith.negf %194 : vector<8x128xf32>
    %196 = math.exp %195 : vector<8x128xf32>
    %cst_39 = arith.constant 1.000000e+00 : f32
    %197 = vector.broadcast %cst_39 : f32 to vector<8x128xf32>
    %198 = arith.addf %197, %196 : vector<8x128xf32>
    %199 = arith.divf %197, %198 : vector<8x128xf32>
    %200 = vector.extract_strided_slice %194 {offsets = [0, 64], sizes = [8, 32], strides = [1, 1]} : vector<8x128xf32> to vector<8x32xf32>
    %201 = math.tanh %200 : vector<8x32xf32>
    %202 = vector.extract_strided_slice %199 {offsets = [0, 0], sizes = [8, 32], strides = [1, 1]} : vector<8x128xf32> to vector<8x32xf32>
    %203 = arith.mulf %202, %201 : vector<8x32xf32>
    %204 = vector.extract_strided_slice %199 {offsets = [0, 96], sizes = [8, 32], strides = [1, 1]} : vector<8x128xf32> to vector<8x32xf32>
    %205 = math.tanh %203 : vector<8x32xf32>
    %206 = arith.mulf %204, %205 : vector<8x32xf32>
    %c32 = arith.constant 32 : index
    %c0_40 = arith.constant 0 : index
    %207 = vector.load %arg5[%c32, %c0_40] : memref<97x128xf32, #tpu.memory_space<vmem>>, vector<32x128xf32>
    %208 = arith.truncf %207 : vector<32x128xf32> to vector<32x128xbf16>
    %c64 = arith.constant 64 : index
    %c0_41 = arith.constant 0 : index
    %209 = vector.load %arg5[%c64, %c0_41] : memref<97x128xf32, #tpu.memory_space<vmem>>, vector<32x128xf32>
    %210 = arith.truncf %209 : vector<32x128xf32> to vector<32x128xbf16>
    %c96 = arith.constant 96 : index
    %c0_42 = arith.constant 0 : index
    %211 = vector.load %arg5[%c96, %c0_42] : memref<97x128xf32, #tpu.memory_space<vmem>>, vector<1x128xf32>
    %212 = arith.truncf %193 : vector<8x32xf32> to vector<8x32xbf16>
    %cst_43 = arith.constant dense<0.000000e+00> : vector<8x128xf32>
    %213 = tpu.matmul %212, %208, %cst_43 {dimension_numbers = #tpu.dot_dimension_numbers<[1], [0], [0], [1], [0, 0, 1, 1], [], []>} : vector<8x32xbf16>, vector<32x128xbf16>, vector<8x128xf32> -> vector<8x128xf32>
    %214 = arith.truncf %206 : vector<8x32xf32> to vector<8x32xbf16>
    %cst_44 = arith.constant dense<0.000000e+00> : vector<8x128xf32>
    %215 = tpu.matmul %214, %210, %cst_44 {dimension_numbers = #tpu.dot_dimension_numbers<[1], [0], [0], [1], [0, 0, 1, 1], [], []>} : vector<8x32xbf16>, vector<32x128xbf16>, vector<8x128xf32> -> vector<8x128xf32>
    %216 = arith.addf %213, %215 : vector<8x128xf32>
    %217 = vector.broadcast %211 : vector<1x128xf32> to vector<8x128xf32>
    %218 = arith.addf %216, %217 : vector<8x128xf32>
    %c0_45 = arith.constant 0 : index
    %c0_46 = arith.constant 0 : index
    %219 = vector.load %arg6[%c0_45, %c0_46] : memref<8x128xf32, #tpu.memory_space<vmem>>, vector<8x128xf32>
    tpu.vector_store %arg6[%c0_45, %c0_46], %218 {strides = array<i32>} : memref<8x128xf32, #tpu.memory_space<vmem>>, vector<8x128xf32>,
    return
  }
}

</mosaic_0001>

<bundles_post_ra>
// kernel: tpu_custom_call.1
= control target key start
LH: loop header
LB: loop body
LE: loop exit
PB: predicated region body
PF: predicated region fallthrough
CT: control target
= control target key end

     0   :  { %11 = vsyncpa [#allocation3], 0  ;;  %s1967_s0 = inlined_call_operand.vmem [shape: s32[64,1], index: 0, kind: input, shape index: {}]   ;;  %s1968_s1 = inlined_call_operand.hbm [shape: f32[32,32], index: 1, kind: input, shape index: {}]   ;;  %s1969_s2 = inlined_call_operand.vmem [shape: f32[32,16], index: 2, kind: input, shape index: {}]   ;;  %s1970_s3 = inlined_call_operand.vmem [shape: f32[57,32], index: 3, kind: input, shape index: {}]   ;;  %s1971_s4 = inlined_call_operand.vmem [shape: f32[17,256], index: 4, kind: input, shape index: {}]   ;;  %s1972_s5 = inlined_call_operand.vmem [shape: f32[97,128], index: 5, kind: input, shape index: {}]   ;;  %s1973_s6 = inlined_call_operand.hbm [shape: f32[8,128], index: 6, kind: output, shape index: {}]  }
   0x1   :  { %12 = vsyncpa [#allocation4], 0  ;;  %s1609_s21 = smov [#allocation2]   ;;  %s1561_s25 = scalar_lea.hbm %s1968_s1, 512 }
   0x2   :  { %s20_s22 = sshll.u32 %s1609_s21, 4  ;;  %p1562_p0 = scmp.ne.s32.totalorder %s1968_s1, %s1561_s25  ;;  %s21_s22 = int_to_ptr.vmem [resolvable:$true] %s20_s22 }
   0x3   :  { %p1565_p1 = scmp.lt.u32.totalorder %s1561_s25, %s1968_s1 }
   0x5   :  { %p1567_p2 = pnand %p1565_p1, %p1562_p0 }
   0x7   :  { %1570 = shalt.err (!%p1567_p2)
}
   0x8   :  { %s1571_s30 = scalar_lea.vmem %s21_s22, 512  ;;  %p1576_p4 = scmp.lt.s32.totalorder %s21_s22, %s21_s22 }
   0x9   :  { %p1572_p3 = scmp.ne.s32.totalorder %s21_s22, %s1571_s30  ;;  %p1577_p5 = scmp.lt.s32.totalorder %s1571_s30, %s1571_s30 }
   0xb   :  { %p1578_p6 = por %p1577_p5, %p1576_p4 }
   0xd   :  { %p1579_p7 = pnand %p1578_p6, %p1572_p3 }
   0xf   :  { %1582 = shalt.err (!%p1579_p7)
}
  0x10   :  { %s1610_s7 = smov 128   ;;  %s1611_s8 = smov 8  }
  0x11   :  { %26 = dma.hbm_to_vmem [thread:$0]  %s1968_s1, 512, %s21_s22, [#allocation3], %s1610_s7, %s1610_s7, %s1611_s8  }
  0x12   :  { %1605 = dma.done.wait [#allocation3], 512  }
  0x13   :  { %1606 = vsyncadd [#allocation3], 4294966784  ;;  %v39_v0 = vld [vmem:[%s1970_s3] sm:$0xff]  ;;  %v40_v1 = vld [vmem:[%s1970_s3 + $0x8] sm:$0xff]  ;;  %vm62_vm0 = vcmask 130048   ;;  %vm124_vm1 = vcmask 261120   ;;  %v292_v53 = vlaneseq }
  0x14   :  { %v56_v2 = vld [vmem:[%s1969_s2] sm:$0xff]  ;;  %v41_v3 = vpack.c.bf16 %v40_v1, %v39_v0  ;;  %v57_v4 = vld [vmem:[%s1969_s2 + $0x8] sm:$0xff]  ;;  %v58_v5 = vld [vmem:[%s1969_s2 + $0x10] sm:$0xff]  ;;  %v1612_v40 = vmov 0   ;;  %v1613_v56 = vmov 0.0   ;;  %vm1614_vm10 = vmmov 0  }
  0x15   :  { %v59_v6 = vld [vmem:[%s1969_s2 + $0x18] sm:$0xff]  ;;  %v60_v7 = vpack.c.bf16 %v57_v4, %v56_v2  ;;  %v50_v9 = vld [vmem:[#allocation2] sm:$0xff]  ;;  %v51_v10 = vld [vmem:[#allocation2 + $0x8] sm:$0xff]  ;;  %1488 = vset.pattern.permute.xlu1 %v1612_v40  ;;  %1487 = vset.pattern.permute.xlu0 %v1612_v40  ;;  %v1733_v54 = vand.u32 127, %v292_v53  ;;  %s1616_s15 = smov 32   ;;  %s1617_s19 = smov 96  }
  0x16   :  { %1355 = vmatprep.subr.bf16.mxu0 %v41_v3  ;;  %v61_v8 = vpack.c.bf16 %v59_v6, %v58_v5  ;;  %v54_v11 = vpack.c.bf16 %v51_v10, %v50_v9  ;;  %v52_v18 = vld [vmem:[#allocation2 + $0x10] sm:$0xff]  ;;  %v53_v19 = vld [vmem:[#allocation2 + $0x18] sm:$0xff]  ;;  %v44_v22 = vld [vmem:[%s1970_s3 + $0x20] sm:$0xff]  ;;  %s1618_s7 = smov [#allocation5]  }
  0x17   :  { %1356 = vmatpush3.bf16.msra.mxu0 %v41_v3  ;;  %1357 = vmatprep.mubr.msk.bf16.mxu0 %vm62_vm0, %v60_v7  ;;  %v55_v20 = vpack.c.bf16 %v53_v19, %v52_v18  ;;  %v43_v21 = vld [vmem:[%s1970_s3 + $0x18] sm:$0xff]  ;;  %v45_v24 = vld [vmem:[%s1970_s3 + $0x28] sm:$0xff]  ;;  %v46_v25 = vld [vmem:[%s1970_s3 + $0x30] sm:$0xff]  ;;  %s1249_s8 = sshll.u32 %s1618_s7, 4  ;;  %s1250_s8 = int_to_ptr.vmem [resolvable:$true] %s1249_s8 }
  0x18   :  { %1365 = vmatprep.mubr.msk.bf16.mxu1 %vm124_vm1, %v54_v11  ;;  %v47_v23 = vpack.c.bf16 %v44_v22, %v43_v21  ;;  %v48_v26 = vpack.c.bf16 %v46_v25, %v45_v24  ;;  %v1260_v28 = vld [vmem:[%s1970_s3 + $0x10] ss:$0 sm:$0xff]  ;;  %v294_v39 = vld [vmem:[%s1967_s0] sm:$0xff]  ;;  %v297_v41 = vld [vmem:[%s1967_s0 + $0x18] sm:$0xff]  ;;  %s1583_s9 = scalar_lea.vmem %s1250_s8, 128  ;;  %p1588_p9 = scmp.lt.s32.totalorder %s1250_s8, %s1250_s8 }
  0x19   :  { %v296_v38 = vld [vmem:[%s1967_s0 + $0x10] sm:$0xff]  ;;  %303 = vperm.xlu0 %1487, %v294_v39   ;;  %v295_v42 = vld [vmem:[%s1967_s0 + $0x8] sm:$0xff]  ;;  %v298_v44 = vld [vmem:[%s1967_s0 + $0x20] sm:$0xff]  ;;  %p1584_p8 = scmp.ne.s32.totalorder %s1250_s8, %s1583_s9  ;;  %p1589_p10 = scmp.lt.s32.totalorder %s1583_s9, %s1583_s9 }
  0x1a   :  { %1358 = vmatmul.mubr.msk.bf16.vlgmr.msra.gmra.mrb[0].mxu0 %vm62_vm0, %v61_v8  ;;  %1369 = vmatprep.subr.bf16.mxu0 %v47_v23  ;;  %v299_v43 = vld [vmem:[%s1967_s0 + $0x28] sm:$0xff]  ;;  %v301_v45 = vld [vmem:[%s1967_s0 + $0x38] sm:$0xff]  ;;  %v300_v46 = vld [vmem:[%s1967_s0 + $0x30] sm:$0xff] }
  0x1b   :  { %1370 = vmatpush3.bf16.msra.mxu0 %v47_v23  ;;  %309 = vperm.xlu1 %1488, %v296_v38   ;;  %v434_v61 = vld [vmem:[%s1971_s4 + $0x8] sm:$0xff]  ;;  %v436_v62 = vld [vmem:[%s1971_s4 + $0x18] sm:$0xff]  ;;  %v433_v63 = vld [vmem:[%s1971_s4] sm:$0xff]  ;;  %p1590_p11 = por %p1589_p10, %p1588_p9 }
  0x1c   :  { %1371 = vmatprep.subr.bf16.mxu0 %v48_v26  ;;  %v435_v0 = vld [vmem:[%s1971_s4 + $0x10] sm:$0xff]  ;;  %v438_v1 = vpack.c.bf16 %v436_v62, %v434_v61  ;;  %v1265_v5 = vld [vmem:[%s1970_s3 + $0x38] ss:$0 sm:$0xff]  ;;  %v534_v18 = vld [vmem:[%s1972_s5] sm:$0xff] }
  0x1d   :  { %306 = vperm.xlu0 %1487, %v295_v42   ;;  %v437_v2 = vpack.c.bf16 %v435_v0, %v433_v63  ;;  %v535_v19 = vld [vmem:[%s1972_s5 + $0x8] sm:$0xff]  ;;  %p1591_p12 = pnand %p1590_p11, %p1584_p8 }
  0x1f   :  { %1372 = vmatpush3.bf16.msra.mxu0 %v48_v26  ;;  %312 = vperm.xlu1 %1488, %v297_v41   ;;  %v1772_v26 = vpack.c.bf16 %v535_v19, %v534_v18 }
  0x21   :  { %315 = vperm.xlu0 %1487, %v298_v44  }
  0x23   :  { %318 = vperm.xlu1 %1488, %v299_v43  }
  0x25   :  { %321 = vperm.xlu0 %1487, %v300_v46  }
  0x27   :  { %324 = vperm.xlu1 %1488, %v301_v45  }
  0x98   :  { %v304_v55 = vpop.permute.xlu0 %303 }
  0x99   :  { %vm326_vm2 = vcmp.eq.s32.totalorder %v1733_v54, %v304_v55  ;;  %v1823_v55 = vld [vmem:[%s1971_s4 + $0x20] ss:$8 sm:$0x3]  ;;  %s1615_s4 = smov 64  }
  0x9a   :  { %v1268_v57 = vsel %vm326_vm2, 1.0, %v1613_v56  ;;  %v310_v3 = vpop.permute.xlu1 %309 }
  0x9b   :  { %vm328_vm4 = vcmp.eq.s32.totalorder %v1733_v54, %v310_v3 }
  0x9c   :  { %v307_v58 = vpop.permute.xlu0 %306 }
  0x9d   :  { %vm327_vm3 = vcmp.eq.s32.totalorder %v1733_v54, %v307_v58 }
  0x9e   :  { %v1269_v59 = vsel %vm327_vm3, 1.0, %v1613_v56  ;;  %v313_v6 = vpop.permute.xlu1 %312 }
  0x9f   :  { %v350_v60 = vpack.c.bf16 %v1269_v59, %v1268_v57  ;;  %vm329_vm5 = vcmp.eq.s32.totalorder %v1733_v54, %v313_v6 }
  0xa0   :  { %v1271_v21 = vsel %vm329_vm5, 1.0, %v1613_v56 }
  0xed   :  { %v1359_v12 = vpop.f32.mrb[0].mxu0 }
  0xee   :  { %v103_v13 = vpop.f32.mrb[1].mxu0 }
  0xef   :  { %v1360_v14 = vpop.f32.mrb[2].mxu0 }
  0xf0   :  { %v119_v15 = vpack.c.bf16 %v1360_v14, %v1359_v12  ;;  %v106_v16 = vpop.f32.mrb[3].mxu0 }
  0xf1   :  { %v118_v17 = vpack.c.bf16 %v106_v16, %v103_v13  ;;  %v319_v16 = vpop.permute.xlu1 %318 }
  0xf2   :  { %vm331_vm6 = vcmp.eq.s32.totalorder %v1733_v54, %v319_v16 }
  0xf3   :  { %1361 = vmatprep.subr.bf16.mxu1 %v118_v17  ;;  %v1273_v22 = vsel %vm331_vm6, 1.0, %v1613_v56 }
  0xf4   :  { %1362 = vmatpush3.bf16.msra.mxu1 %v118_v17  ;;  %v316_v17 = vpop.permute.xlu0 %315 }
  0xf5   :  { %1363 = vmatprep.subr.bf16.mxu1 %v119_v15  ;;  %vm330_vm7 = vcmp.eq.s32.totalorder %v1733_v54, %v316_v17  ;;  %v325_v24 = vpop.permute.xlu1 %324 }
  0xf6   :  { %v1272_v23 = vsel %vm330_vm7, 1.0, %v1613_v56  ;;  %vm333_vm8 = vcmp.eq.s32.totalorder %v1733_v54, %v325_v24 }
  0xf8   :  { %1364 = vmatpush3.bf16.msra.mxu1 %v119_v15  ;;  %v322_v25 = vpop.permute.xlu0 %321 }
  0xf9   :  { %vm332_vm9 = vcmp.eq.s32.totalorder %v1733_v54, %v322_v25 }
  0xfb   :  { %1366 = vmatmul.mubr.msk.bf16.vlgmr.msra.gmra.mrb[0].mxu1 %vm124_vm1, %v55_v20 }
  0xfc   :  { %1381 = vmatprep.mubr.msk.bf16.mxu1 %vm124_vm1, %v54_v11 }
 0x1ce   :  { %v1367_v27 = vpop.f32.mrb[0].mxu1 }
 0x1cf   :  { %v165_v29 = vpop.f32.mrb[1].mxu1  ;;  %v174_v31 = vadd.f32 %v1367_v27, %v1260_v28 }
 0x1d0   :  { %v1368_v30 = vpop.f32.mrb[2].mxu1  ;;  %v166_v34 = vadd.f32 %v1260_v28, %v165_v29  ;;  %v1275_v29 = vsel %vm333_vm8, 1.0, %v1613_v56 }
 0x1d1   :  { %v177_v32 = vadd.f32 %v1368_v30, %v1260_v28  ;;  %v168_v33 = vpop.f32.mrb[3].mxu1  ;;  %v1274_v30 = vsel %vm332_vm9, 1.0, %v1613_v56 }
 0x1d2   :  { %v169_v35 = vadd.f32 %v1260_v28, %v168_v33  ;;  %v352_v28 = vpack.c.bf16 %v1273_v22, %v1272_v23  ;;  %v537_v33 = vld [vmem:[%s1972_s5 + $0x18] sm:$0xff] }
 0x1d3   :  { %v181_v36 = vpack.c.bf16 %v177_v32, %v174_v31  ;;  %v353_v31 = vpack.c.bf16 %v1275_v29, %v1274_v30  ;;  %v536_v32 = vld [vmem:[%s1972_s5 + $0x10] sm:$0xff] }
 0x1d4   :  { %v180_v37 = vpack.c.bf16 %v169_v35, %v166_v34  ;;  %v1790_v34 = vpack.c.bf16 %v537_v33, %v536_v32 }
 0x1d6   :  { %1373 = vmatprep.mubr.msk.bf16.mxu0 %vm124_vm1, %v180_v37 }
 0x1d7   :  { %1374 = vmatmul.mubr.msk.bf16.vlgmr.msra.gmra.mrb[4].mxu0 %vm124_vm1, %v181_v36 }
 0x1d8   :  { %1389 = vmatprep.mubr.msk.bf16.mxu0 %vm124_vm1, %v350_v60 }
 0x2aa   :  { %v1375_v47 = vpop.f32.mrb[4].mxu0 }
 0x2ab   :  { %v222_v48 = vpop.f32.mrb[5].mxu0 }
 0x2ac   :  { %v1376_v49 = vpop.f32.mrb[6].mxu0 }
 0x2ad   :  { %v238_v50 = vpack.c.bf16 %v1376_v49, %v1375_v47  ;;  %v225_v51 = vpop.f32.mrb[7].mxu0 }
 0x2ae   :  { %v237_v52 = vpack.c.bf16 %v225_v51, %v222_v48 }
 0x2b0   :  { %1377 = vmatprep.subr.bf16.mxu1 %v237_v52 }
 0x2b1   :  { %1378 = vmatpush3.bf16.msra.mxu1 %v237_v52  ;;  %v1817_v52 = vshrl.u32 %v292_v53, 7 }
 0x2b2   :  { %1379 = vmatprep.subr.bf16.mxu1 %v238_v50 }
 0x2b3   :  { %v448_v54 = vsub.s32 0, %v1817_v52 }
 0x2b5   :  { %1380 = vmatpush3.bf16.msra.mxu1 %v238_v50 }
 0x2b6   :  { %468 = vmatprep.subr.bf16.mxu1 %v438_v1 }
 0x2b8   :  { %1382 = vmatmul.mubr.msk.bf16.vlgmr.msra.gmra.mrb[4].mxu1 %vm124_vm1, %v55_v20  ;;  %v1270_v20 = vsel %vm328_vm4, 1.0, %v1613_v56 }
 0x2b9   :  { %500 = vmatprep.mubr.bf16.mxu1 %v1612_v40  ;;  %469 = vmatpush1.bf16.msra.mxu1 %v437_v2  ;;  %v351_v27 = vpack.c.bf16 %v1271_v21, %v1270_v20 }
 0x2ba   :  { %1421 = vmatprep.subr.bf16.mxu1 %v1613_v56 }
 0x38b   :  { %v1383_v4 = vpop.f32.mrb[4].mxu1 }
 0x38c   :  { %v277_v7 = vpop.f32.mrb[5].mxu1  ;;  %v286_v9 = vadd.f32 %v1383_v4, %v1265_v5 }
 0x38d   :  { %v1384_v8 = vpop.f32.mrb[6].mxu1  ;;  %v278_v12 = vadd.f32 %v1265_v5, %v277_v7 }
 0x38e   :  { %v289_v10 = vadd.f32 %v1384_v8, %v1265_v5  ;;  %v280_v11 = vpop.f32.mrb[7].mxu1 }
 0x38f   :  { %v281_v13 = vadd.f32 %v1265_v5, %v280_v11 }
 0x390   :  { %v355_v14 = vpack.c.bf16 %v289_v10, %v286_v9 }
 0x391   :  { %v354_v15 = vpack.c.bf16 %v281_v13, %v278_v12 }
 0x393   :  { %1385 = vmatprep.subr.bf16.mxu0 %v354_v15 }
 0x394   :  { %1386 = vmatpush3.bf16.msra.mxu0 %v354_v15 }
 0x395   :  { %1387 = vmatprep.subr.bf16.mxu0 %v355_v14 }
 0x398   :  { %1388 = vmatpush3.bf16.msra.mxu0 %v355_v14 }
 0x399   :  { %1397 = vmatprep.subr.bf16.mxu0 %v1613_v56 }
 0x39b   :  { %1390 = vmatmul.mubr.msk.bf16.vlgmr.msra.gmra.mrb[8].mxu0 %vm124_vm1, %v351_v27 }
 0x39c   :  { %1393 = vmatprep.mubr.msk.bf16.mxu0 %vm124_vm1, %v352_v28  ;;  %1398 = vmatpush3.bf16.msra.mxu0 %v1772_v26 }
 0x39d   :  { %1399 = vmatprep.subr.bf16.mxu0 %v1613_v56 }
 0x3a0   :  { %1400 = vmatpush3.bf16.msra.mxu0 %v1790_v34 }
 0x3a1   :  { %1405 = vmatprep.subr.bf16.mxu0 %v1613_v56 }
 0x3a3   :  { %1394 = vmatmul.mubr.msk.bf16.gmra.mrb[12].mxu0 %vm124_vm1, %v353_v31 }
 0x3a4   :  { %1401 = vmatprep.mubr.msk.bf16.mxu0 %vm1614_vm10, %v1613_v56 }
 0x3ab   :  { %1402 = vmatmul.mubr.bf16.vlgmr.msra.gmra.mrb[16].mxu0 %v1612_v40 }
 0x3ac   :  { %1406 = vmatpush3.bf16.msra.mxu0 %v1772_v26  ;;  %1409 = vmatprep.mubr.msk.bf16.mxu0 %vm1614_vm10, %v1613_v56 }
 0x3ad   :  { %1407 = vmatprep.subr.bf16.mxu0 %v1613_v56 }
 0x3b0   :  { %1408 = vmatpush3.bf16.msra.mxu0 %v1790_v34 }
 0x3b1   :  { %1413 = vmatprep.subr.bf16.mxu0 %v1613_v56 }
 0x46e   :  { %v1391_v35 = vpop.f32.mrb[8].mxu0 }
 0x46f   :  { %v402_v36 = vpop.f32.mrb[9].mxu0 }
 0x470   :  { %v1392_v37 = vpop.f32.mrb[10].mxu0 }
 0x471   :  { %v442_v38 = vpack.c.bf16 %v1392_v37, %v1391_v35  ;;  %v405_v39 = vpop.f32.mrb[11].mxu0 }
 0x472   :  { %v441_v41 = vpack.c.bf16 %v405_v39, %v402_v36 }
 0x474   :  { %1281 = vmatmul.mubr.msk.bf16.vlgmr.msra.gmra.mrb[8].mxu1 %vm62_vm0, %v441_v41 }
 0x475   :  { %508 = vmatprep.mubr.bf16.mxu1 %v1612_v40  ;;  %1422 = vmatpush3.bf16.msra.mxu1 %v1772_v26 }
 0x476   :  { %v1395_v42 = vpop.f32.mrb[12].mxu0  ;;  %1423 = vmatprep.subr.bf16.mxu1 %v1613_v56 }
 0x477   :  { %v418_v43 = vpop.f32.mrb[13].mxu0 }
 0x478   :  { %v1396_v44 = vpop.f32.mrb[14].mxu0 }
 0x479   :  { %v444_v45 = vpack.c.bf16 %v1396_v44, %v1395_v42  ;;  %v421_v46 = vpop.f32.mrb[15].mxu0  ;;  %1424 = vmatpush3.bf16.msra.mxu1 %v1790_v34 }
 0x47a   :  { %v443_v47 = vpack.c.bf16 %v421_v46, %v418_v43  ;;  %1437 = vmatprep.subr.bf16.mxu1 %v1613_v56 }
 0x47c   :  { %1282 = vmatmul.mubr.msk.bf16.gmra.mrb[12].mxu1 %vm62_vm0, %v442_v38 }
 0x47d   :  { %516 = vmatprep.mubr.bf16.mxu1 %v1612_v40 }
 0x47e   :  { %v577_v48 = vpop.f32.mrb[16].mxu0 }
 0x47f   :  { %v1403_v49 = vpop.f32.mrb[17].mxu0 }
 0x480   :  { %v580_v50 = vpop.f32.mrb[18].mxu0 }
 0x481   :  { %v1404_v51 = vpop.f32.mrb[19].mxu0 }
 0x484   :  { %1283 = vmatmul.mubr.msk.bf16.gmra.mrb[16].mxu1 %vm62_vm0, %v443_v47 }
 0x485   :  { %524 = vmatprep.mubr.bf16.mxu1 %v1612_v40  ;;  %v449_v40 = vrot.slane %v1823_v55, %v448_v54 }
 0x48c   :  { %1284 = vmatmul.mubr.msk.bf16.gmra.mrb[20].mxu1 %vm62_vm0, %v444_v45 }
 0x48d   :  { %1425 = vmatprep.mubr.msk.bf16.mxu1 %vm1614_vm10, %v1613_v56 }
 0x547   :  { %v502_v57 = vpop.f32.mrb[8].mxu1 }
 0x548   :  { %v503_v58 = vadd.f32 %v502_v57, %v449_v40  ;;  %v504_v59 = vpop.f32.mrb[9].mxu1 }
 0x549   :  { %v505_v60 = vpop.f32.mrb[10].mxu1 }
 0x54a   :  { %v583_v61 = vadd.f32 %v577_v48, %v503_v58  ;;  %v506_v62 = vadd.f32 %v505_v60, %v449_v40  ;;  %v507_v63 = vpop.f32.mrb[11].mxu1 }
 0x54c   :  { %1489 = vtanh.f32 %v583_v61  ;;  %v1285_v18 = vmul.f32 -1.442695, %v583_v61 }
 0x54e   :  { %1491 = vpow2.f32 %v1285_v18 }
 0x54f   :  { %v510_v0 = vpop.f32.mrb[12].mxu1 }
 0x550   :  { %v1826_v53 = vadd.f32 %v510_v0, %v449_v40  ;;  %v512_v1 = vpop.f32.mrb[13].mxu1 }
 0x551   :  { %v513_v2 = vpop.f32.mrb[14].mxu1 }
 0x552   :  { %v1828_v3 = vadd.f32 %v513_v2, %v449_v40  ;;  %v515_v4 = vpop.f32.mrb[15].mxu1 }
 0x556   :  { %v1490_v5 = vpop.eup %1489 }
 0x557   :  { %593 = vrot.lane.b32.xlu0 %v1490_v5, %s1615_s4  ;;  %v518_v6 = vpop.f32.mrb[16].mxu1 }
 0x558   :  { %v1831_v7 = vadd.f32 %v518_v6, %v449_v40  ;;  %v520_v8 = vpop.f32.mrb[17].mxu1  ;;  %v1492_v19 = vpop.eup %1491 }
 0x559   :  { %v521_v9 = vpop.f32.mrb[18].mxu1  ;;  %v587_v20 = vadd.f32 1.0, %v1492_v19 }
 0x55a   :  { %v1833_v10 = vadd.f32 %v521_v9, %v449_v40  ;;  %v523_v11 = vpop.f32.mrb[19].mxu1 }
 0x55b   :  { %1493 = vrcp.f32 %v587_v20 }
 0x55f   :  { %v526_v12 = vpop.f32.mrb[20].mxu1 }
 0x560   :  { %v1835_v13 = vadd.f32 %v526_v12, %v449_v40  ;;  %v528_v14 = vpop.f32.mrb[21].mxu1 }
 0x561   :  { %v529_v15 = vpop.f32.mrb[22].mxu1 }
 0x562   :  { %v1837_v16 = vadd.f32 %v529_v15, %v449_v40  ;;  %v1839_v17 = vpop.f32.mrb[23].mxu1 }
 0x565   :  { %v1494_v21 = vpop.eup %1493 }
 0x566   :  { %v591_v24 = vmul.f32 0.0, %v1494_v21 }
 0x5c9   :  { %v594_v22 = vpop.permute.xlu0 %593 }
 0x5ca   :  { %v596_v23 = vmul.f32 %v1494_v21, %v594_v22 }
 0x5cc   :  { %598 = vrot.lane.b32.xlu1 %v596_v23, %s1616_s15 }
 0x63e   :  { %v599_v25 = vpop.permute.xlu1 %598 }
 0x63f   :  { %v601_v27 = vadd.f32 %v599_v25, %v591_v24 }
 0x641   :  { %1495 = vtanh.f32 %v601_v27 }
 0x64b   :  { %v1496_v28 = vpop.eup %1495 }
 0x64c   :  { %604 = vrot.lane.b32.xlu0 %v1496_v28, %s1615_s4 }
 0x6be   :  { %v605_v29 = vpop.permute.xlu0 %604 }
 0x6bf   :  { %v607_v30 = vmul.f32 %v1494_v21, %v605_v29 }
 0x6c1   :  { %v608_v31 = vpack.c.bf16 %v607_v30, %v607_v30 }
 0x6c3   :  { %610 = vrot.lane.b32.xlu1 %v608_v31, %s1616_s15 }
 0x735   :  { %v611_v32 = vpop.permute.xlu1 %610 }
 0x736   :  { %1410 = vmatmul.mubr.msk.bf16.vlgmr.msra.gmra.mrb[20].mxu0 %vm124_vm1, %v611_v32 }
 0x737   :  { %1414 = vmatpush3.bf16.msra.mxu0 %v1772_v26  ;;  %1417 = vmatprep.mubr.msk.bf16.mxu0 %vm1614_vm10, %v1613_v56 }
 0x738   :  { %1415 = vmatprep.subr.bf16.mxu0 %v1613_v56 }
 0x73b   :  { %1416 = vmatpush3.bf16.msra.mxu0 %v1790_v34 }
 0x73c   :  { %1429 = vmatprep.subr.bf16.mxu0 %v1613_v56 }
 0x809   :  { %v649_v33 = vpop.f32.mrb[20].mxu0 }
 0x80a   :  { %v655_v35 = vadd.f32 %v649_v33, %v506_v62  ;;  %v1411_v36 = vpop.f32.mrb[21].mxu0 }
 0x80b   :  { %v652_v37 = vpop.f32.mrb[22].mxu0 }
 0x80c   :  { %1497 = vtanh.f32 %v655_v35  ;;  %v1412_v38 = vpop.f32.mrb[23].mxu0  ;;  %v1287_v41 = vmul.f32 -1.442695, %v655_v35 }
 0x80e   :  { %1499 = vpow2.f32 %v1287_v41 }
 0x816   :  { %v1498_v39 = vpop.eup %1497 }
 0x817   :  { %665 = vrot.lane.b32.xlu0 %v1498_v39, %s1615_s4 }
 0x818   :  { %v1500_v42 = vpop.eup %1499 }
 0x819   :  { %v659_v43 = vadd.f32 1.0, %v1500_v42 }
 0x81b   :  { %1501 = vrcp.f32 %v659_v43 }
 0x825   :  { %v1502_v44 = vpop.eup %1501 }
 0x826   :  { %v663_v47 = vmul.f32 %v1502_v44, %v601_v27 }
 0x889   :  { %v666_v45 = vpop.permute.xlu0 %665 }
 0x88a   :  { %v668_v46 = vmul.f32 %v1502_v44, %v666_v45 }
 0x88c   :  { %670 = vrot.lane.b32.xlu1 %v668_v46, %s1616_s15 }
 0x8fe   :  { %v671_v48 = vpop.permute.xlu1 %670 }
 0x8ff   :  { %v673_v49 = vadd.f32 %v671_v48, %v663_v47 }
 0x901   :  { %1503 = vtanh.f32 %v673_v49 }
 0x90b   :  { %v1504_v50 = vpop.eup %1503 }
 0x90c   :  { %676 = vrot.lane.b32.xlu0 %v1504_v50, %s1615_s4 }
 0x97e   :  { %v677_v51 = vpop.permute.xlu0 %676 }
 0x97f   :  { %v679_v54 = vmul.f32 %v1502_v44, %v677_v51 }
 0x981   :  { %v680_v40 = vpack.c.bf16 %v679_v54, %v679_v54 }
 0x983   :  { %682 = vrot.lane.b32.xlu1 %v680_v40, %s1616_s15 }
 0x9f5   :  { %v683_v57 = vpop.permute.xlu1 %682 }
 0x9f6   :  { %1418 = vmatmul.mubr.msk.bf16.vlgmr.msra.gmra.mrb[24].mxu0 %vm124_vm1, %v683_v57 }
 0x9f7   :  { %1430 = vmatpush3.bf16.msra.mxu0 %v1772_v26  ;;  %1433 = vmatprep.mubr.msk.bf16.mxu0 %vm1614_vm10, %v1613_v56 }
 0x9f8   :  { %1431 = vmatprep.subr.bf16.mxu0 %v1613_v56 }
 0x9fb   :  { %1432 = vmatpush3.bf16.msra.mxu0 %v1790_v34 }
 0x9fc   :  { %1445 = vmatprep.subr.bf16.mxu0 %v1613_v56 }
 0xac9   :  { %v721_v58 = vpop.f32.mrb[24].mxu0 }
 0xaca   :  { %v727_v59 = vadd.f32 %v721_v58, %v1826_v53  ;;  %v1419_v60 = vpop.f32.mrb[25].mxu0 }
 0xacb   :  { %v724_v61 = vpop.f32.mrb[26].mxu0 }
 0xacc   :  { %1505 = vtanh.f32 %v727_v59  ;;  %v1420_v62 = vpop.f32.mrb[27].mxu0  ;;  %v1289_v0 = vmul.f32 -1.442695, %v727_v59 }
 0xace   :  { %1507 = vpow2.f32 %v1289_v0 }
 0xad6   :  { %v1506_v63 = vpop.eup %1505 }
 0xad7   :  { %737 = vrot.lane.b32.xlu0 %v1506_v63, %s1615_s4 }
 0xad8   :  { %v1508_v1 = vpop.eup %1507 }
 0xad9   :  { %v731_v2 = vadd.f32 1.0, %v1508_v1 }
 0xadb   :  { %1509 = vrcp.f32 %v731_v2 }
 0xae5   :  { %v1510_v4 = vpop.eup %1509 }
 0xae6   :  { %v735_v8 = vmul.f32 %v1510_v4, %v673_v49 }
 0xb49   :  { %v738_v5 = vpop.permute.xlu0 %737 }
 0xb4a   :  { %v740_v6 = vmul.f32 %v1510_v4, %v738_v5 }
 0xb4c   :  { %742 = vrot.lane.b32.xlu1 %v740_v6, %s1616_s15 }
 0xbbe   :  { %v743_v9 = vpop.permute.xlu1 %742 }
 0xbbf   :  { %v745_v53 = vadd.f32 %v743_v9, %v735_v8 }
 0xbc1   :  { %1511 = vtanh.f32 %v745_v53 }
 0xbcb   :  { %v1512_v11 = vpop.eup %1511 }
 0xbcc   :  { %748 = vrot.lane.b32.xlu0 %v1512_v11, %s1615_s4 }
 0xc3e   :  { %v749_v12 = vpop.permute.xlu0 %748 }
 0xc3f   :  { %v751_v14 = vmul.f32 %v1510_v4, %v749_v12 }
 0xc41   :  { %v752_v15 = vpack.c.bf16 %v751_v14, %v751_v14 }
 0xc43   :  { %754 = vrot.lane.b32.xlu1 %v752_v15, %s1616_s15 }
 0xcb5   :  { %v755_v18 = vpop.permute.xlu1 %754 }
 0xcb6   :  { %1426 = vmatmul.mubr.msk.bf16.vlgmr.msra.gmra.mrb[24].mxu1 %vm124_vm1, %v755_v18 }
 0xcb7   :  { %1438 = vmatpush3.bf16.msra.mxu1 %v1772_v26  ;;  %1441 = vmatprep.mubr.msk.bf16.mxu1 %vm1614_vm10, %v1613_v56 }
 0xcb8   :  { %1439 = vmatprep.subr.bf16.mxu1 %v1613_v56 }
 0xcbb   :  { %1440 = vmatpush3.bf16.msra.mxu1 %v1790_v34 }
 0xcbc   :  { %1453 = vmatprep.subr.bf16.mxu1 %v1613_v56 }
 0xd89   :  { %v793_v19 = vpop.f32.mrb[24].mxu1 }
 0xd8a   :  { %v799_v20 = vadd.f32 %v793_v19, %v1828_v3  ;;  %v1427_v21 = vpop.f32.mrb[25].mxu1 }
 0xd8b   :  { %v796_v22 = vpop.f32.mrb[26].mxu1 }
 0xd8c   :  { %1513 = vtanh.f32 %v799_v20  ;;  %v1428_v23 = vpop.f32.mrb[27].mxu1  ;;  %v1291_v25 = vmul.f32 -1.442695, %v799_v20 }
 0xd8e   :  { %1515 = vpow2.f32 %v1291_v25 }
 0xd96   :  { %v1514_v24 = vpop.eup %1513 }
 0xd97   :  { %809 = vrot.lane.b32.xlu0 %v1514_v24, %s1615_s4 }
 0xd98   :  { %v1516_v27 = vpop.eup %1515 }
 0xd99   :  { %v803_v28 = vadd.f32 1.0, %v1516_v27 }
 0xd9b   :  { %1517 = vrcp.f32 %v803_v28 }
 0xda5   :  { %v1518_v29 = vpop.eup %1517 }
 0xda6   :  { %v807_v32 = vmul.f32 %v1518_v29, %v745_v53 }
 0xe09   :  { %v810_v30 = vpop.permute.xlu0 %809 }
 0xe0a   :  { %v812_v31 = vmul.f32 %v1518_v29, %v810_v30 }
 0xe0c   :  { %814 = vrot.lane.b32.xlu1 %v812_v31, %s1616_s15 }
 0xe7e   :  { %v815_v33 = vpop.permute.xlu1 %814 }
 0xe7f   :  { %v817_v3 = vadd.f32 %v815_v33, %v807_v32 }
 0xe81   :  { %1519 = vtanh.f32 %v817_v3 }
 0xe8b   :  { %v1520_v35 = vpop.eup %1519 }
 0xe8c   :  { %820 = vrot.lane.b32.xlu0 %v1520_v35, %s1615_s4 }
 0xefe   :  { %v821_v36 = vpop.permute.xlu0 %820 }
 0xeff   :  { %v823_v37 = vmul.f32 %v1518_v29, %v821_v36 }
 0xf01   :  { %v824_v38 = vpack.c.bf16 %v823_v37, %v823_v37 }
 0xf03   :  { %826 = vrot.lane.b32.xlu1 %v824_v38, %s1616_s15 }
 0xf75   :  { %v827_v39 = vpop.permute.xlu1 %826 }
 0xf76   :  { %1434 = vmatmul.mubr.msk.bf16.vlgmr.msra.gmra.mrb[28].mxu0 %vm124_vm1, %v827_v39 }
 0xf77   :  { %1446 = vmatpush3.bf16.msra.mxu0 %v1772_v26  ;;  %1449 = vmatprep.mubr.msk.bf16.mxu0 %vm1614_vm10, %v1613_v56 }
 0xf78   :  { %1447 = vmatprep.subr.bf16.mxu0 %v1613_v56 }
 0xf7b   :  { %1448 = vmatpush3.bf16.msra.mxu0 %v1790_v34 }
 0xf7c   :  { %1461 = vmatprep.subr.bf16.mxu0 %v1613_v56 }
0x1049   :  { %v865_v41 = vpop.f32.mrb[28].mxu0 }
0x104a   :  { %v871_v42 = vadd.f32 %v865_v41, %v1831_v7  ;;  %v1435_v43 = vpop.f32.mrb[29].mxu0 }
0x104b   :  { %v868_v44 = vpop.f32.mrb[30].mxu0 }
0x104c   :  { %1521 = vtanh.f32 %v871_v42  ;;  %v1436_v45 = vpop.f32.mrb[31].mxu0  ;;  %v1293_v47 = vmul.f32 -1.442695, %v871_v42  ;;  %v452_v42 = vsub.s32 1, %v1817_v52 }
0x104e   :  { %1523 = vpow2.f32 %v1293_v47  ;;  %v453_v43 = vrot.slane %v1823_v55, %v452_v42 }
0x1056   :  { %v1522_v46 = vpop.eup %1521 }
0x1057   :  { %881 = vrot.lane.b32.xlu0 %v1522_v46, %s1615_s4 }
0x1058   :  { %v1524_v48 = vpop.eup %1523 }
0x1059   :  { %v875_v49 = vadd.f32 1.0, %v1524_v48  ;;  %v532_v48 = vadd.f32 %v1839_v17, %v453_v43 }
0x105b   :  { %1525 = vrcp.f32 %v875_v49  ;;  %v1300_v52 = vmul.f32 -1.442695, %v532_v48 }
0x1065   :  { %v1526_v50 = vpop.eup %1525 }
0x1066   :  { %v879_v40 = vmul.f32 %v1526_v50, %v817_v3 }
0x10c9   :  { %v882_v51 = vpop.permute.xlu0 %881 }
0x10ca   :  { %v884_v54 = vmul.f32 %v1526_v50, %v882_v51 }
0x10cc   :  { %886 = vrot.lane.b32.xlu1 %v884_v54, %s1616_s15 }
0x113e   :  { %v887_v57 = vpop.permute.xlu1 %886 }
0x113f   :  { %v889_v7 = vadd.f32 %v887_v57, %v879_v40 }
0x1141   :  { %1527 = vtanh.f32 %v889_v7 }
0x114b   :  { %v1528_v58 = vpop.eup %1527 }
0x114c   :  { %892 = vrot.lane.b32.xlu0 %v1528_v58, %s1615_s4 }
0x11be   :  { %v893_v59 = vpop.permute.xlu0 %892 }
0x11bf   :  { %v895_v60 = vmul.f32 %v1526_v50, %v893_v59 }
0x11c1   :  { %v896_v61 = vpack.c.bf16 %v895_v60, %v895_v60 }
0x11c3   :  { %898 = vrot.lane.b32.xlu1 %v896_v61, %s1616_s15 }
0x1235   :  { %v899_v62 = vpop.permute.xlu1 %898 }
0x1236   :  { %1442 = vmatmul.mubr.msk.bf16.vlgmr.msra.gmra.mrb[28].mxu1 %vm124_vm1, %v899_v62  ;;  %v1136_v62 = vld [vmem:[%s1972_s5 + $0x40] sm:$0xff] }
0x1237   :  { %1454 = vmatpush3.bf16.msra.mxu1 %v1772_v26  ;;  %1457 = vmatprep.mubr.msk.bf16.mxu1 %vm1614_vm10, %v1613_v56 }
0x1238   :  { %1455 = vmatprep.subr.bf16.mxu1 %v1613_v56 }
0x123b   :  { %1456 = vmatpush3.bf16.msra.mxu1 %v1790_v34 }
0x123c   :  { %1469 = vmatprep.subr.bf16.mxu1 %v1613_v56 }
0x1309   :  { %v937_v63 = vpop.f32.mrb[28].mxu1 }
0x130a   :  { %v943_v0 = vadd.f32 %v937_v63, %v1833_v10  ;;  %v1443_v1 = vpop.f32.mrb[29].mxu1  ;;  %v1137_v63 = vld [vmem:[%s1972_s5 + $0x48] sm:$0xff] }
0x130b   :  { %v940_v2 = vpop.f32.mrb[30].mxu1 }
0x130c   :  { %1529 = vtanh.f32 %v943_v0  ;;  %v1444_v4 = vpop.f32.mrb[31].mxu1  ;;  %v1295_v26 = vmul.f32 -1.442695, %v943_v0  ;;  %v1140_v0 = vpack.c.bf16 %v1137_v63, %v1136_v62 }
0x130e   :  { %1531 = vpow2.f32 %v1295_v26  ;;  %v1138_v26 = vld [vmem:[%s1972_s5 + $0x50] sm:$0xff] }
0x1316   :  { %v1530_v5 = vpop.eup %1529 }
0x1317   :  { %953 = vrot.lane.b32.xlu0 %v1530_v5, %s1615_s4 }
0x1318   :  { %v1532_v6 = vpop.eup %1531 }
0x1319   :  { %v947_v8 = vadd.f32 1.0, %v1532_v6  ;;  %v1139_v6 = vld [vmem:[%s1972_s5 + $0x58] sm:$0xff] }
0x131b   :  { %1533 = vrcp.f32 %v947_v8  ;;  %v1141_v8 = vpack.c.bf16 %v1139_v6, %v1138_v26 }
0x1325   :  { %v1534_v9 = vpop.eup %1533 }
0x1326   :  { %v951_v11 = vmul.f32 %v1534_v9, %v889_v7 }
0x1389   :  { %v954_v53 = vpop.permute.xlu0 %953 }
0x138a   :  { %v956_v34 = vmul.f32 %v1534_v9, %v954_v53  ;;  %v1131_v53 = vld [vmem:[%s1972_s5 + $0x28] sm:$0xff] }
0x138c   :  { %958 = vrot.lane.b32.xlu1 %v956_v34, %s1616_s15  ;;  %v1132_v34 = vld [vmem:[%s1972_s5 + $0x30] sm:$0xff] }
0x13fe   :  { %v959_v12 = vpop.permute.xlu1 %958 }
0x13ff   :  { %v961_v10 = vadd.f32 %v959_v12, %v951_v11  ;;  %v1133_v12 = vld [vmem:[%s1972_s5 + $0x38] sm:$0xff] }
0x1401   :  { %1535 = vtanh.f32 %v961_v10 }
0x140b   :  { %v1536_v14 = vpop.eup %1535 }
0x140c   :  { %964 = vrot.lane.b32.xlu0 %v1536_v14, %s1615_s4 }
0x147e   :  { %v965_v15 = vpop.permute.xlu0 %964 }
0x147f   :  { %v967_v18 = vmul.f32 %v1534_v9, %v965_v15  ;;  %v1130_v9 = vld [vmem:[%s1972_s5 + $0x20] sm:$0xff] }
0x1480   :  { %v1134_v11 = vpack.c.bf16 %v1131_v53, %v1130_v9 }
0x1481   :  { %v968_v19 = vpack.c.bf16 %v967_v18, %v967_v18 }
0x1483   :  { %970 = vrot.lane.b32.xlu1 %v968_v19, %s1616_s15 }
0x14f5   :  { %v971_v20 = vpop.permute.xlu1 %970 }
0x14f6   :  { %1450 = vmatmul.mubr.msk.bf16.vlgmr.msra.gmra.mrb[32].mxu0 %vm124_vm1, %v971_v20 }
0x14f7   :  { %1465 = vmatprep.mubr.msk.bf16.mxu0 %vm1614_vm10, %v1613_v56  ;;  %1462 = vmatpush3.bf16.msra.mxu0 %v1140_v0 }
0x14f8   :  { %1463 = vmatprep.subr.bf16.mxu0 %v1613_v56 }
0x14fb   :  { %1464 = vmatpush3.bf16.msra.mxu0 %v1141_v8 }
0x15c9   :  { %v1009_v21 = vpop.f32.mrb[32].mxu0 }
0x15ca   :  { %v1015_v22 = vadd.f32 %v1009_v21, %v1835_v13  ;;  %v1451_v23 = vpop.f32.mrb[33].mxu0 }
0x15cb   :  { %v1012_v24 = vpop.f32.mrb[34].mxu0 }
0x15cc   :  { %1537 = vtanh.f32 %v1015_v22  ;;  %v1452_v25 = vpop.f32.mrb[35].mxu0  ;;  %v1297_v28 = vmul.f32 -1.442695, %v1015_v22 }
0x15ce   :  { %1539 = vpow2.f32 %v1297_v28 }
0x15d6   :  { %v1538_v27 = vpop.eup %1537 }
0x15d7   :  { %1025 = vrot.lane.b32.xlu0 %v1538_v27, %s1615_s4 }
0x15d8   :  { %v1540_v29 = vpop.eup %1539 }
0x15d9   :  { %v1019_v30 = vadd.f32 1.0, %v1540_v29  ;;  %v1303_v29 = vld [vmem:[%s1972_s5 + $0x60] ss:$0 sm:$0xff] }
0x15db   :  { %1541 = vrcp.f32 %v1019_v30 }
0x15e5   :  { %v1542_v31 = vpop.eup %1541 }
0x15e6   :  { %v1023_v3 = vmul.f32 %v1542_v31, %v961_v10  ;;  %v1135_v10 = vpack.c.bf16 %v1133_v12, %v1132_v34 }
0x1649   :  { %v1026_v32 = vpop.permute.xlu0 %1025 }
0x164a   :  { %v1028_v33 = vmul.f32 %v1542_v31, %v1026_v32 }
0x164c   :  { %1030 = vrot.lane.b32.xlu1 %v1028_v33, %s1616_s15 }
0x16be   :  { %v1031_v35 = vpop.permute.xlu1 %1030 }
0x16bf   :  { %v1033_v13 = vadd.f32 %v1031_v35, %v1023_v3 }
0x16c1   :  { %1543 = vtanh.f32 %v1033_v13 }
0x16cb   :  { %v1544_v36 = vpop.eup %1543 }
0x16cc   :  { %1036 = vrot.lane.b32.xlu0 %v1544_v36, %s1615_s4 }
0x173e   :  { %v1037_v37 = vpop.permute.xlu0 %1036 }
0x173f   :  { %v1039_v38 = vmul.f32 %v1542_v31, %v1037_v37 }
0x1741   :  { %v1040_v39 = vpack.c.bf16 %v1039_v38, %v1039_v38 }
0x1743   :  { %1042 = vrot.lane.b32.xlu1 %v1040_v39, %s1616_s15 }
0x17b5   :  { %v1043_v41 = vpop.permute.xlu1 %1042 }
0x17b6   :  { %1458 = vmatmul.mubr.msk.bf16.vlgmr.msra.gmra.mrb[32].mxu1 %vm124_vm1, %v1043_v41 }
0x17b7   :  { %1473 = vmatprep.mubr.msk.bf16.mxu1 %vm1614_vm10, %v1613_v56  ;;  %1470 = vmatpush3.bf16.msra.mxu1 %v1134_v11 }
0x17b8   :  { %1471 = vmatprep.subr.bf16.mxu1 %v1613_v56 }
0x17bb   :  { %1472 = vmatpush3.bf16.msra.mxu1 %v1135_v10 }
0x1889   :  { %v1081_v44 = vpop.f32.mrb[32].mxu1 }
0x188a   :  { %v1087_v45 = vadd.f32 %v1081_v44, %v1837_v16  ;;  %v1459_v46 = vpop.f32.mrb[33].mxu1 }
0x188b   :  { %v1084_v47 = vpop.f32.mrb[34].mxu1 }
0x188c   :  { %1545 = vtanh.f32 %v1087_v45  ;;  %v1460_v49 = vpop.f32.mrb[35].mxu1  ;;  %v1299_v54 = vmul.f32 -1.442695, %v1087_v45 }
0x188d   :  { %1547 = vtanh.f32 %v532_v48 }
0x188e   :  { %1549 = vpow2.f32 %v1299_v54 }
0x188f   :  { %1551 = vpow2.f32 %v1300_v52 }
0x1896   :  { %v1546_v50 = vpop.eup %1545 }
0x1897   :  { %1097 = vrot.lane.b32.xlu0 %v1546_v50, %s1615_s4  ;;  %v1548_v51 = vpop.eup %1547 }
0x1898   :  { %v1550_v55 = vpop.eup %1549 }
0x1899   :  { %v1091_v40 = vadd.f32 1.0, %v1550_v55  ;;  %v1552_v16 = vpop.eup %1551 }
0x189a   :  { %v1115_v57 = vadd.f32 1.0, %v1552_v16 }
0x189b   :  { %1120 = vrot.lane.b32.xlu0 %v1548_v51, %s1615_s4  ;;  %1553 = vrcp.f32 %v1091_v40 }
0x189c   :  { %1555 = vrcp.f32 %v1115_v57 }
0x18a5   :  { %v1554_v17 = vpop.eup %1553 }
0x18a6   :  { %v1556_v59 = vpop.eup %1555  ;;  %v1095_v2 = vmul.f32 %v1554_v17, %v1033_v13 }
0x1909   :  { %v1098_v7 = vpop.permute.xlu0 %1097 }
0x190a   :  { %v1100_v58 = vmul.f32 %v1554_v17, %v1098_v7 }
0x190c   :  { %1102 = vrot.lane.b32.xlu1 %v1100_v58, %s1616_s15 }
0x190d   :  { %v1121_v60 = vpop.permute.xlu0 %1120 }
0x190e   :  { %v1123_v61 = vmul.f32 %v1556_v59, %v1121_v60 }
0x1910   :  { %1557 = vtanh.f32 %v1123_v61 }
0x191a   :  { %v1558_v1 = vpop.eup %1557 }
0x191b   :  { %1126 = vrot.lane.b32.xlu0 %v1558_v1, %s1617_s19 }
0x197e   :  { %v1103_v4 = vpop.permute.xlu1 %1102 }
0x197f   :  { %v1105_v5 = vadd.f32 %v1103_v4, %v1095_v2 }
0x1981   :  { %1559 = vtanh.f32 %v1105_v5 }
0x198b   :  { %v1560_v14 = vpop.eup %1559 }
0x198c   :  { %1108 = vrot.lane.b32.xlu1 %v1560_v14, %s1615_s4 }
0x198d   :  { %v1127_v15 = vpop.permute.xlu0 %1126 }
0x198e   :  { %v1129_v18 = vmul.f32 %v1556_v59, %v1127_v15 }
0x1990   :  { %v1144_v19 = vpack.c.bf16 %v1129_v18, %v1129_v18 }
0x1992   :  { %1146 = vrot.lane.b32.xlu1 %v1144_v19, %s1616_s15 }
0x19fe   :  { %v1109_v20 = vpop.permute.xlu1 %1108 }
0x19ff   :  { %v1111_v21 = vmul.f32 %v1554_v17, %v1109_v20 }
0x1a01   :  { %v1143_v22 = vpack.c.bf16 %v1111_v21, %v1111_v21 }
0x1a03   :  { %1192 = vrot.lane.b32.xlu0 %v1143_v22, %s1616_s15 }
0x1a04   :  { %v1147_v23 = vpop.permute.xlu1 %1146 }
0x1a05   :  { %1466 = vmatmul.mubr.msk.bf16.vlgmr.msra.gmra.mrb[36].mxu0 %vm124_vm1, %v1147_v23 }
0x1a75   :  { %v1193_v24 = vpop.permute.xlu0 %1192 }
0x1a76   :  { %1474 = vmatmul.mubr.msk.bf16.vlgmr.msra.gmra.mrb[36].mxu1 %vm124_vm1, %v1193_v24 }
0x1ad8   :  { %v1185_v56 = vpop.f32.mrb[36].mxu0 }
0x1ad9   :  { %v1467_v25 = vpop.f32.mrb[37].mxu0 }
0x1ada   :  { %v1188_v27 = vpop.f32.mrb[38].mxu0 }
0x1adb   :  { %v1468_v28 = vpop.f32.mrb[39].mxu0 }
0x1b49   :  { %v1231_v30 = vpop.f32.mrb[36].mxu1 }
0x1b4a   :  { %v1232_v31 = vadd.f32 %v1231_v30, %v1185_v56  ;;  %v1475_v32 = vpop.f32.mrb[37].mxu1 }
0x1b4b   :  { %v1234_v33 = vpop.f32.mrb[38].mxu1 }
0x1b4c   :  { %v1241_v3 = vadd.f32 %v1303_v29, %v1232_v31  ;;  %v1476_v35 = vpop.f32.mrb[39].mxu1 }
0x1b4e   :  { %1242 = vst [vmem:[#allocation5] sm:$0xff] %v1241_v3 }
0x1b4f   :  { %1594 = shalt.err (!%p1591_p12)
}
0x1b50   :  { %s1595_s5 = scalar_lea.hbm %s1973_s6, 128 }
0x1b51   :  { %p1596_p13 = scmp.ne.s32.totalorder %s1973_s6, %s1595_s5  ;;  %p1599_p0 = scmp.lt.u32.totalorder %s1595_s5, %s1973_s6 }
0x1b53   :  { %p1601_p1 = pnand %p1599_p0, %p1596_p13 }
0x1b55   :  { %1604 = shalt.err (!%p1601_p1)
}
0x1b56   :  { %1252 = dma.vmem_to_hbm [thread:$0]  %s1250_s8, 128, %s1973_s6, [#allocation4]  }
0x1b57   :  { %1607 = dma.done.wait [#allocation4], 128  }
0x1b58   :  { %1608 = vsyncadd [#allocation4], 4294967168 }
0x1b59   :  { %1256 = vsyncpa [#allocation3], 1 }
0x1b5a   :  { %1257 = vsyncpa [#allocation4], 1 }

</bundles_post_ra>
